<compile_context>
chip_gen: v7x
topology: tpu7x:2x2x1
jax: 0.10.0
libtpu: 0.0.40
codegen_flags: <defaults>
</compile_context>

<pallas_src>
import functools

import jax
import jax.numpy as jnp
from jax.experimental import pallas as pl
from jax.experimental.pallas import tpu as pltpu


def _round_up(x: int, m: int) -> int:
    return ((x + m - 1) // m) * m


def _gather_kernel(ids_ref, table_ref, out_ref, row_buf, sem, *, token_tile):
    # ids_ref:   (N_pad,)            int32, SMEM (scalar prefetch)
    # table_ref: (V, D_pad)          f32,   HBM  (memory_space=pl.ANY)
    # out_ref:   (token_tile, D_pad) f32,   VMEM output block
    # row_buf:   (token_tile, D_pad) f32,   VMEM scratch
    # sem:       scalar DMA semaphore shared by all row copies of this tile
    base = pl.program_id(0) * token_tile

    # Issue all row DMAs for this tile (HBM row -> scratch row), then wait.
    @pl.loop(0, token_tile)
    def _start(j):
        row = ids_ref[base + j]
        pltpu.make_async_copy(table_ref.at[row], row_buf.at[j], sem).start()

    @pl.loop(0, token_tile)
    def _wait(j):
        # Each wait consumes exactly one row's byte count from the shared sem;
        # after token_tile waits every row copy has completed.
        pltpu.make_async_copy(table_ref.at[0], row_buf.at[j], sem).wait()

    # Lane-dense store of the gathered tile into the pipelined output block.
    out_ref[...] = row_buf[...]


def sentence_embedding_forward(ids, table, *, token_tile=128):
    """Pallas equivalent of SentenceEmbeddingModel.forward.

    ids:   int32  [B, S]
    table: float32 [V, D]
    returns float32 [B, S, D]
    """
    B, S = ids.shape
    V, D = table.shape

    n_tokens = B * S
    # Token tile: 128 at real sizes; at toy sizes just the 8-aligned token count.
    tt = min(token_tile, _round_up(n_tokens, 8))
    n_pad = _round_up(n_tokens, tt)
    d_pad = _round_up(D, 128)

    # Addressing data: flatten, clamp (torch would raise on OOB ids), pad with 0.
    ids_flat = jnp.clip(ids.reshape(-1).astype(jnp.int32), 0, V - 1)
    if n_pad != n_tokens:
        ids_flat = jnp.pad(ids_flat, (0, n_pad - n_tokens))

    # Lane-dense table/output: pad D up to a multiple of 128 lanes.
    table_p = table if d_pad == D else jnp.pad(table, ((0, 0), (0, d_pad - D)))

    kernel = functools.partial(_gather_kernel, token_tile=tt)

    out = pl.pallas_call(
        kernel,
        out_shape=jax.ShapeDtypeStruct((n_pad, d_pad), table.dtype),
        grid_spec=pltpu.PrefetchScalarGridSpec(
            num_scalar_prefetch=1,              # ids -> SMEM, passed to index_maps
            grid=(n_pad // tt,),
            in_specs=[
                pl.BlockSpec(memory_space=pl.ANY),   # table stays in HBM
            ],
            out_specs=pl.BlockSpec((tt, d_pad), lambda t, ids: (t, 0)),
            scratch_shapes=[
                pltpu.VMEM((tt, d_pad), table.dtype),   # gathered-rows buffer
                pltpu.SemaphoreType.DMA,                # shared row-copy semaphore
            ],
        ),
        compiler_params=pltpu.CompilerParams(
            dimension_semantics=("parallel",),   # token tiles are independent
        ),
    )(ids_flat, table_p)

    return out[:n_tokens, :D].reshape(B, S, D)


if __name__ == "__main__":
    # Small, deterministic synthetic setup (no tokenizer / checkpoint files).
    vocab_size = 512       # stand-in for sp.get_piece_size()
    embedding_dim = 300    # matches the module's embedding_dim = 300
    batch, seq = 2, 8

    key = jax.random.PRNGKey(0)
    k_tab, k_ids = jax.random.split(key)

    # nn.Embedding default init: weight ~ N(0, 1)
    table = jax.random.normal(k_tab, (vocab_size, embedding_dim), dtype=jnp.float32)
    ids = jax.random.randint(k_ids, (batch, seq), 0, vocab_size, dtype=jnp.int32)

    out = sentence_embedding_forward(ids, table)
    out = jax.block_until_ready(out)

    # Reference: plain gather, matches torch nn.Embedding semantics.
    ref = jnp.take(table, ids, axis=0)
    assert out.shape == (batch, seq, embedding_dim)
    assert jnp.array_equal(out, ref), "mismatch vs reference gather"

    print("KERNEL_OK")
</pallas_src>

<mosaic_0001>
module attributes {stable_mosaic.version = 11 : i64} {
  func.func @_gather_kernel(%arg0: i32, %arg1: memref<16xi32, #tpu.memory_space<smem>>, %arg2: memref<512x384xf32, #tpu.memory_space<any>>, %arg3: memref<16x384xf32, #tpu.memory_space<vmem>>, %arg4: memref<16x384xf32, #tpu.memory_space<vmem>>, %arg5: memref<!tpu.dma_semaphore, #tpu.memory_space<semaphore_mem>>) attributes {dimension_semantics = [#tpu.dimension_semantics<parallel>], iteration_bounds = array<i64: 1>, scalar_prefetch = 1 : i64, scratch_operands = 2 : i64, tpu.core_type = #tpu.core_type<tc>, window_params = [{}, {transform_indices = @transform_1, window_bounds = array<i64: 16, 384>}]} {
    %c16_i32 = arith.constant 16 : i32
    %0 = arith.muli %arg0, %c16_i32 : i32
    %c0_i32 = arith.constant 0 : i32
    %c16_i32_0 = arith.constant 16 : i32
    %1 = arith.addi %c0_i32, %c16_i32_0 : i32
    %c1_i32 = arith.constant 1 : i32
    scf.for %arg6 = %c0_i32 to %1 step %c1_i32  : i32 {
      %c1_i32_9 = arith.constant 1 : i32
      %5 = arith.muli %arg6, %c1_i32_9 : i32
      %c0_i32_10 = arith.constant 0 : i32
      %6 = arith.addi %c0_i32_10, %5 : i32
      %7 = arith.addi %0, %6 : i32
      %8 = arith.index_cast %7 : i32 to index
      %9 = memref.load %arg1[%8] : memref<16xi32, #tpu.memory_space<smem>>
      %c0_i32_11 = arith.constant 0 : i32
      %10 = tpu.memref_slice %arg2[%9, %c0_i32_11] : memref<512x384xf32, #tpu.memory_space<any>> -> memref<1x384xf32, #tpu.memory_space<any>>
      %11 = tpu.memref_squeeze %10 : memref<1x384xf32, #tpu.memory_space<any>> -> memref<384xf32, #tpu.memory_space<any>>
      %c0_i32_12 = arith.constant 0 : i32
      %12 = tpu.memref_slice %arg4[%6, %c0_i32_12] : memref<16x384xf32, #tpu.memory_space<vmem>> -> memref<1x384xf32, #tpu.memory_space<vmem>>
      %13 = tpu.memref_squeeze %12 : memref<1x384xf32, #tpu.memory_space<vmem>> -> memref<384xf32, #tpu.memory_space<vmem>>
      tpu.enqueue_dma source(%11 : memref<384xf32, #tpu.memory_space<any>>) target(%13 : memref<384xf32, #tpu.memory_space<vmem>>) target_semaphore(%arg5 : memref<!tpu.dma_semaphore, #tpu.memory_space<semaphore_mem>>)
    }
    %c16_i32_1 = arith.constant 16 : i32
    %c0_i32_2 = arith.constant 0 : i32
    %c16_i32_3 = arith.constant 16 : i32
    %2 = arith.addi %c0_i32_2, %c16_i32_3 : i32
    %c1_i32_4 = arith.constant 1 : i32
    scf.for %arg6 = %c0_i32_2 to %2 step %c1_i32_4  : i32 {
      %c1_i32_9 = arith.constant 1 : i32
      %5 = arith.muli %arg6, %c1_i32_9 : i32
      %c0_i32_10 = arith.constant 0 : i32
      %6 = arith.addi %c0_i32_10, %5 : i32
      %c0_i32_11 = arith.constant 0 : i32
      %c0_i32_12 = arith.constant 0 : i32
      %7 = tpu.memref_slice %arg2[%c0_i32_11, %c0_i32_12] : memref<512x384xf32, #tpu.memory_space<any>> -> memref<1x384xf32, #tpu.memory_space<any>>
      %8 = tpu.memref_squeeze %7 : memref<1x384xf32, #tpu.memory_space<any>> -> memref<384xf32, #tpu.memory_space<any>>
      %c0_i32_13 = arith.constant 0 : i32
      %9 = tpu.memref_slice %arg4[%6, %c0_i32_13] : memref<16x384xf32, #tpu.memory_space<vmem>> -> memref<1x384xf32, #tpu.memory_space<vmem>>
      %10 = tpu.memref_squeeze %9 : memref<1x384xf32, #tpu.memory_space<vmem>> -> memref<384xf32, #tpu.memory_space<vmem>>
      tpu.wait_dma2 semaphore(%arg5 : memref<!tpu.dma_semaphore, #tpu.memory_space<semaphore_mem>>) src(%8 : memref<384xf32, #tpu.memory_space<any>>) dst(%10 : memref<384xf32, #tpu.memory_space<vmem>>)
    }
    %c16_i32_5 = arith.constant 16 : i32
    %c0 = arith.constant 0 : index
    %c0_6 = arith.constant 0 : index
    %3 = vector.load %arg4[%c0, %c0_6] : memref<16x384xf32, #tpu.memory_space<vmem>>, vector<16x384xf32>
    %c0_7 = arith.constant 0 : index
    %c0_8 = arith.constant 0 : index
    %4 = vector.load %arg3[%c0_7, %c0_8] : memref<16x384xf32, #tpu.memory_space<vmem>>, vector<16x384xf32>
    tpu.vector_store %arg3[%c0_7, %c0_8], %3 {strides = array<i32>} : memref<16x384xf32, #tpu.memory_space<vmem>>, vector<16x384xf32>,
    return
  }
  func.func @transform_1(%arg0: i32, %arg1: memref<16xi32, #tpu.memory_space<smem>>) -> (i32, i32) {
    %c0_i32 = arith.constant 0 : i32
    %c0_i32_0 = arith.constant 0 : i32
    return %arg0, %c0_i32 : i32, i32
  }
}

</mosaic_0001>

<bundles_post_ra>
// kernel: tpu_custom_call.1
= control target key start
LH: loop header
LB: loop body
LE: loop exit
PB: predicated region body
PF: predicated region fallthrough
CT: control target
= control target key end

     0   :  { %s270_s0 = inlined_call_operand.hbm [shape: s32[16], index: 0, kind: input, shape index: {}]   ;;  %s271_s1 = inlined_call_operand.hbm [shape: f32[512,384], index: 1, kind: input, shape index: {}]   ;;  %s272_s2 = inlined_call_operand.hbm [shape: f32[16,384], index: 2, kind: output, shape index: {}]  }
   0x1   :  { %s120_s11 = scalar_lea.hbm %s270_s0, 16 }
   0x2   :  { %p121_p0 = scmp.ne.s32.totalorder %s270_s0, %s120_s11  ;;  %p124_p1 = scmp.lt.u32.totalorder %s120_s11, %s270_s0 }
   0x4   :  { %p126_p2 = pnand %p124_p1, %p121_p0 }
   0x6   :  { %129 = shalt.err (!%p126_p2)  }
   0x7   :  { %s198_s16 = smov [#allocation5]  }
   0x8   :  { %8 = dma.hbm_to_smem %s270_s0, 16, %s198_s16, [#allocation4] }
   0x9   :  { %184 = dma.done.wait [#allocation4], 16 }
   0xa   :  { %185 = vsyncadd [#allocation4], 4294967280 }
   0xb   :  { %10 = sfence }
   0xc   :  { %11 = vsyncpa [#allocation7], 0  ;;  %s232_s19 = smov 0  }
   0xd LB: > { %s20_s20 = sld [smem:[#allocation5 + %s192_s19]]  ;;  %s27_s21 = sshrl.u32 %s192_s19, 3  ;;  %s192_s19 = sphi %s232_s19, %s18_s19  }
   0xe   : > { %s28_s22 = sand.u32 7, %s192_s19   ;;  %s29_s23 = smul.u32 24, %s27_s21 }
   0xf   : > { %s132_s9 = scalar_lea.hbm %s271_s1, 24576 }
  0x10   : > { %s30_s24 = sadd.s32 %s29_s23, %s28_s22 }
  0x11   : > { %s31_s0 = scalar_lea.vmem [#allocation2], %s30_s24 }
  0x12   : > { %s33_s25 = sshll.u32 %s31_s0, 4  ;;  %s240_s25 = int_to_ptr.vmem [resolvable:$true] %s33_s25 }
  0x13   : > { %s21_s26 = sshrl.u32 %s20_s20, 3  ;;  %s22_s27 = sand.u32 7, %s20_s20  }
  0x14   : > { %s23_s28 = smul.u32 24, %s21_s26 }
  0x16   : > { %s24_s29 = sadd.s32 %s23_s28, %s22_s27 }
  0x17   : > { %s96_s30 = sshll.u32 %s24_s29, 4 }
  0x18   : > { %s26_s5 = scalar_lea.hbm %s271_s1, %s96_s30 }
  0x19   : > { %s130_s6 = scalar_lea.hbm %s26_s5, 48  ;;  %p133_p4 = scmp.lt.u32.totalorder %s26_s5, %s271_s1 }
  0x1a   : > { %p131_p3 = scmp.ne.s32.totalorder %s26_s5, %s130_s6  ;;  %p134_p5 = scmp.lt.u32.totalorder %s132_s9, %s130_s6 }
  0x1b   : > { %p136_p7 = scmp.lt.u32.totalorder %s130_s6, %s26_s5 }
  0x1c   : > { %p135_p6 = por %p134_p5, %p133_p4 }
  0x1e   : > { %p137_p8 = por %p136_p7, %p135_p6 }
  0x20   : > { %p138_p9 = pnand %p137_p8, %p131_p3 }
  0x22   : > { %141 = shalt.err (!%p138_p9)  }
  0x23   : > { %s142_s12 = scalar_lea.vmem %s240_s25, 48  ;;  %s199_s13 = smov [#allocation2]  }
  0x24   : > { %p143_p10 = scmp.ne.s32.totalorder %s240_s25, %s142_s12  ;;  %s144_s14 = sshll.u32 %s199_s13, 4  ;;  %s145_s14 = int_to_ptr.vmem [resolvable:$false] %s144_s14 }
  0x25   : > { %s146_s15 = scalar_lea.vmem %s145_s14, 768  ;;  %p147_p11 = scmp.lt.s32.totalorder %s240_s25, %s145_s14 }
  0x26   : > { %p148_p12 = scmp.lt.s32.totalorder %s146_s15, %s142_s12 }
  0x28   : > { %p149_p13 = por %p148_p12, %p147_p11 }
  0x2a   : > { %p150_p0 = pnand %p149_p13, %p143_p10 }
  0x2c   : > { %153 = shalt.err (!%p150_p0)  }
  0x2d   : > { %s200_s16 = smov 128   ;;  %s201_s17 = smov 1  }
  0x2e   : > { %36 = dma.hbm_to_vmem [thread:$0]  %s26_s5, 48, %s240_s25, [#allocation3], %s200_s16, %s200_s16, %s201_s17 }
  0x2f   : > { %s18_s19 = sadd.s32 1, %s192_s19  }
  0x30   : > { %p15_p1 = scmp.ge.s32.totalorder %s18_s19, 16  }
  0x31   :  { %s194_s18 = smov (%p15_p1), 0  }
  0x32   :  { %17 = sbr.rel (!%p15_p1) target bundleno = 13 (0xd), region = 36 }
  0x39 LB: > { %186 = dma.done.wait [#allocation3], 48  ;;  %s196_s18 = sphi %s194_s18, %s42_s18  }
  0x3a   : > { %187 = vsyncadd [#allocation3], 4294967248  ;;  %s42_s18 = sadd.s32 1, %s196_s18  }
  0x3b   : > { %p39_p2 = scmp.ge.s32.totalorder %s42_s18, 16  }
  0x3c   :  { %v45_v0 = vld [vmem:[#allocation2] sm:$0xff] (%p39_p2)  ;;  %v46_v1 = vld [vmem:[#allocation2 + $0x8] sm:$0xff] (%p39_p2)  ;;  %v47_v2 = vld [vmem:[#allocation2 + $0x10] sm:$0xff] (%p39_p2)  ;;  %s202_s19 = smov (%p39_p2), [#allocation6]  }
  0x3d   :  { %41 = sbr.rel (!%p39_p2) target bundleno = 57 (0x39), region = 47  ;;  %51 = vst [vmem:[#allocation6] sm:$0xff] (%p39_p2), %v45_v0  ;;  %52 = vst [vmem:[#allocation6 + $0x8] sm:$0xff] (%p39_p2), %v46_v1  ;;  %v48_v3 = vld [vmem:[#allocation2 + $0x18] sm:$0xff] (%p39_p2)  ;;  %v49_v4 = vld [vmem:[#allocation2 + $0x20] sm:$0xff] (%p39_p2)  ;;  %s62_s1 = sshll.u32 (%p39_p2), %s202_s19, 4  ;;  %s63_s1 = int_to_ptr.vmem [resolvable:$true] %s62_s1 }
  0x3e   :  { %53 = vst [vmem:[#allocation6 + $0x10] sm:$0xff] (%p39_p2), %v47_v2  ;;  %v50_v5 = vld [vmem:[#allocation2 + $0x28] sm:$0xff] (%p39_p2)  ;;  %54 = vst [vmem:[#allocation6 + $0x18] sm:$0xff] (%p39_p2), %v48_v3  ;;  %s154_s20 = scalar_lea.vmem (%p39_p2), %s63_s1, 768  ;;  %p159_p4 = scmp.lt.s32.totalorder (%p39_p2), %s63_s1, %s63_s1 }
  0x3f   :  { %55 = vst [vmem:[#allocation6 + $0x20] sm:$0xff] (%p39_p2), %v49_v4  ;;  %56 = vst [vmem:[#allocation6 + $0x28] sm:$0xff] (%p39_p2), %v50_v5  ;;  %p155_p3 = scmp.ne.s32.totalorder (%p39_p2), %s63_s1, %s154_s20  ;;  %p160_p5 = scmp.lt.s32.totalorder (%p39_p2), %s154_s20, %s154_s20 }
  0x41   :  { %p161_p6 = por (%p39_p2), %p160_p5, %p159_p4 }
  0x43   :  { %p162_p7 = pnand (%p39_p2), %p161_p6, %p155_p3 }
  0x45   :  { %165 = shalt.err (!%p162_p7)
}
  0x46   :  { %s166_s23 = scalar_lea.hbm %s272_s2, 768 }
  0x47   :  { %p167_p8 = scmp.ne.s32.totalorder %s272_s2, %s166_s23  ;;  %p170_p9 = scmp.lt.u32.totalorder %s166_s23, %s272_s2 }
  0x49   :  { %p172_p10 = pnand %p170_p9, %p167_p8 }
  0x4b   :  { %175 = shalt.err (!%p172_p10)
}
  0x4c   :  { %s203_s27 = smov 384   ;;  %s204_s28 = smov 24  }
  0x4d   :  { %68 = dma.vmem_to_hbm [thread:$0]  %s63_s1, 768, %s272_s2, [#allocation7], %s203_s27, %s203_s27, %s204_s28  }
  0x4e   :  { %188 = dma.done.wait [#allocation7], 768  }
  0x4f   :  { %189 = vsyncadd [#allocation7], 4294966528 }
  0x50   :  { %72 = vsyncpa [#allocation7], 1 }
  0x51   :  { %73 = vsyncmov [#allocation3] }
  0x54   :  { %s74_s3 = vpop.sfrf %73 }
  0x55   :  { %p97_p11 = scmp.ne.s32.totalorder %s74_s3, 0 }
  0x57   :  { %78 = shalt.err (%p97_p11)  }

</bundles_post_ra>
